<compile_context>
chip_gen: v5e
topology: v5e:2x2
jax: 0.10.0
libtpu: 0.0.40
codegen_flags: <defaults>
</compile_context>

<pallas_src>
import jax
import jax.numpy as jnp
import numpy as np
from jax.experimental import pallas as pl
from jax.experimental.pallas import tpu as pltpu


def attention_softmax_kernel(x_ref, w_tr_ref, b_tr_ref, w_q_ref,
                             result_ref, attn_ref):
    # x_ref block: (TB, N, M) -- TB bags per grid step.
    TB, N, M = x_ref.shape
    H = w_tr_ref.shape[1]

    x3 = x_ref[...]                                      # (TB, N, M)
    x2 = x3.reshape(TB * N, M)                           # free when N % 8 == 0

    # keys for every instance of every bag in ONE MXU matmul.
    keys = jnp.dot(x2, w_tr_ref[...],
                   preferred_element_type=jnp.float32)   # (TB*N, H)
    keys = keys + b_tr_ref[...]                          # + (1, H) bias
    keys = jnp.maximum(keys, 0.01 * keys)                # LeakyReLU (slope 0.01)

    # Per-bag scores, laid out (TB, N) with N on the lane axis.
    # NOTE: the scalar query bias b_q is omitted -- softmax is shift-invariant.
    t = keys * w_q_ref[...]                              # (TB*N, H)
    s = jnp.sum(t.reshape(TB, N, H), axis=-1)            # (TB, N) lane reduce

    # Per-bag softmax: per-row lane reduces; never mixes bags.
    s_max = jnp.max(s, axis=-1, keepdims=True)           # (TB, 1)
    e = jnp.exp(s - s_max)
    denom = jnp.sum(e, axis=-1, keepdims=True)           # (TB, 1)
    r = pl.reciprocal(denom, approx=True)                # EUP vrcp
    r = r * (2.0 - denom * r)                            # one Newton step -> f32
    attn = e * r                                         # (TB, N)
    attn_ref[0] = attn

    # Weighted pooling: result[b, m] = sum_n attn[b, n] * x[b, n, m]
    # (VPU multiply + sublane reduce over N.)
    result_ref[0] = jnp.sum(attn[:, :, None] * x3, axis=1)   # (TB, M)


def _choose_block_bags(B, N, M, itemsize=4, target_block_bytes=4 * 1024 * 1024):
    """Aim for a multi-MiB x block per grid step (HBM-bound kernel)."""
    per_bag = max(1, N * M * itemsize)
    return max(1, min(B, target_block_bytes // per_bag))


def attention_softmax_batched(x, w_tr, b_tr, w_q, b_q=None, block_bags=None):
    """x: [B, N, M] (B independent bags). Returns (result [B, M], attn [B, N])."""
    del b_q  # softmax(s + b_q) == softmax(s): the scalar query bias is dead.
    x = jnp.asarray(x, jnp.float32)
    B, N, M = x.shape
    w_tr = jnp.asarray(w_tr, jnp.float32)
    H = w_tr.shape[1]
    w_q_row = jnp.asarray(w_q, jnp.float32).reshape(1, H)
    b_tr_row = jnp.asarray(b_tr, jnp.float32).reshape(1, H)

    if block_bags is None:
        block_bags = _choose_block_bags(B, N, M, x.dtype.itemsize)
    TB = int(min(block_bags, B))

    # Pad B up to a multiple of TB with zero bags (finite outputs, sliced off).
    G = -(-B // TB)
    B_pad = G * TB
    if B_pad != B:
        x = jnp.concatenate([x, jnp.zeros((B_pad - B, N, M), x.dtype)], axis=0)

    # Raise the scoped-VMEM limit only when the (double-buffered) blocks need it.
    est = 2 * (TB * N * M * 4 + TB * (M + N) * 4 + (M * H + 2 * H) * 4)
    vmem_limit = (int(min(1.5 * est, 96 * 1024 * 1024))
                  if est > 24 * 1024 * 1024 else None)

    result, attn = pl.pallas_call(
        attention_softmax_kernel,
        out_shape=(
            jax.ShapeDtypeStruct((G, TB, M), jnp.float32),   # weighted results
            jax.ShapeDtypeStruct((G, TB, N), jnp.float32),   # attention maps
        ),
        grid=(G,),
        in_specs=[
            pl.BlockSpec((TB, N, M), lambda g: (g, 0, 0)),   # TB bags of x
            pl.BlockSpec((M, H), lambda g: (0, 0)),          # shared weights
            pl.BlockSpec((1, H), lambda g: (0, 0)),
            pl.BlockSpec((1, H), lambda g: (0, 0)),
        ],
        out_specs=(
            pl.BlockSpec((1, TB, M), lambda g: (g, 0, 0)),
            pl.BlockSpec((1, TB, N), lambda g: (g, 0, 0)),
        ),
        compiler_params=pltpu.CompilerParams(
            dimension_semantics=("parallel",),               # shards bags on multi-TC
            vmem_limit_bytes=vmem_limit),
    )(x, w_tr, b_tr_row, w_q_row)

    result = result.reshape(B_pad, M)[:B]
    attn = attn.reshape(B_pad, N)[:B]
    return result, attn


def attention_softmax(x, w_tr, b_tr, w_q, b_q=None):
    """Single bag (matches the PyTorch module): x [N, M] -> (result [M], attn [N])."""
    result, attn = attention_softmax_batched(x[None], w_tr, b_tr, w_q, b_q)
    return result[0], attn[0]


def init_params(key, in_features, out_features):
    """Deterministic PyTorch-like Linear init (uniform +-1/sqrt(fan_in))."""
    k1, k2, k3, k4 = jax.random.split(key, 4)
    bound_tr = 1.0 / np.sqrt(in_features)
    bound_q = 1.0 / np.sqrt(out_features)
    w_tr = jax.random.uniform(k1, (in_features, out_features), jnp.float32,
                              -bound_tr, bound_tr)
    b_tr = jax.random.uniform(k2, (out_features,), jnp.float32,
                              -bound_tr, bound_tr)
    w_q = jax.random.uniform(k3, (out_features, 1), jnp.float32,
                             -bound_q, bound_q)
    b_q = jax.random.uniform(k4, (1,), jnp.float32, -bound_q, bound_q)
    return w_tr, b_tr, w_q, b_q


def reference(x, w_tr, b_tr, w_q, b_q):
    """Pure-JAX reference matching the PyTorch module (b_q included)."""
    keys = x @ w_tr + b_tr
    keys = jnp.where(keys > 0, keys, 0.01 * keys)
    raw = (keys @ w_q + b_q)[..., 0]
    attn = jax.nn.softmax(raw, axis=-1)
    result = jnp.einsum('...i,...ij->...j', attn, x)
    return result, attn


if __name__ == "__main__":
    # bags, instances/bag, in_features, out_features
    B, N, M, H = 32, 8, 32, 32
    TB = 16   # 16 bags per grid step -> grid=(2,) (even length, good for 2-TC chips)

    key = jax.random.PRNGKey(0)
    kx, kp = jax.random.split(key)
    x_batch = jax.random.normal(kx, (B, N, M), jnp.float32)
    w_tr, b_tr, w_q, b_q = init_params(kp, M, H)

    # Batched path: one pallas_call, TB bags per grid step.
    result_b, attn_b = attention_softmax_batched(x_batch, w_tr, b_tr, w_q, b_q,
                                                 block_bags=TB)
    jax.block_until_ready((result_b, attn_b))
    result_ref_b, attn_ref_b = reference(x_batch, w_tr, b_tr, w_q, b_q)
    np.testing.assert_allclose(np.asarray(result_b), np.asarray(result_ref_b),
                               rtol=1e-5, atol=1e-5)
    np.testing.assert_allclose(np.asarray(attn_b), np.asarray(attn_ref_b),
                               rtol=1e-5, atol=1e-5)

    # Uneven bag count exercises the zero-bag padding path.
    x_odd = x_batch[:5]
    result_o, attn_o = attention_softmax_batched(x_odd, w_tr, b_tr, w_q, b_q,
                                                 block_bags=4)
    jax.block_until_ready((result_o, attn_o))
    result_ref_o, attn_ref_o = reference(x_odd, w_tr, b_tr, w_q, b_q)
    np.testing.assert_allclose(np.asarray(result_o), np.asarray(result_ref_o),
                               rtol=1e-5, atol=1e-5)
    np.testing.assert_allclose(np.asarray(attn_o), np.asarray(attn_ref_o),
                               rtol=1e-5, atol=1e-5)

    # Single-bag path (matches the PyTorch module's forward signature).
    x = x_batch[0]
    result, attn = attention_softmax(x, w_tr, b_tr, w_q, b_q)
    jax.block_until_ready((result, attn))
    result_ref, attn_ref = reference(x, w_tr, b_tr, w_q, b_q)
    np.testing.assert_allclose(np.asarray(result), np.asarray(result_ref),
                               rtol=1e-5, atol=1e-5)
    np.testing.assert_allclose(np.asarray(attn), np.asarray(attn_ref),
                               rtol=1e-5, atol=1e-5)

    print("KERNEL_OK")
</pallas_src>

<mosaic_0001>
module attributes {stable_mosaic.version = 11 : i64} {
  func.func @attention_softmax_kernel(%arg0: i32, %arg1: memref<16x8x32xf32, #tpu.memory_space<vmem>>, %arg2: memref<32x32xf32, #tpu.memory_space<vmem>>, %arg3: memref<1x32xf32, #tpu.memory_space<vmem>>, %arg4: memref<1x32xf32, #tpu.memory_space<vmem>>, %arg5: memref<1x16x32xf32, #tpu.memory_space<vmem>>, %arg6: memref<1x16x8xf32, #tpu.memory_space<vmem>>) attributes {dimension_semantics = [#tpu.dimension_semantics<parallel>], iteration_bounds = array<i64: 2>, scalar_prefetch = 0 : i64, scratch_operands = 0 : i64, tpu.core_type = #tpu.core_type<tc>, window_params = [{transform_indices = @transform_0, window_bounds = array<i64: 16, 8, 32>}, {pipeline_mode = #tpu.pipeline_mode<synchronous>, transform_indices = @transform_1, window_bounds = array<i64: 32, 32>}, {pipeline_mode = #tpu.pipeline_mode<synchronous>, transform_indices = @transform_2, window_bounds = array<i64: 1, 32>}, {pipeline_mode = #tpu.pipeline_mode<synchronous>, transform_indices = @transform_3, window_bounds = array<i64: 1, 32>}, {transform_indices = @transform_4, window_bounds = array<i64: 1, 16, 32>}, {transform_indices = @transform_5, window_bounds = array<i64: 1, 16, 8>}]} {
    %c0 = arith.constant 0 : index
    %c0_0 = arith.constant 0 : index
    %c0_1 = arith.constant 0 : index
    %0 = vector.load %arg1[%c0, %c0_0, %c0_1] : memref<16x8x32xf32, #tpu.memory_space<vmem>>, vector<16x8x32xf32>
    %1 = vector.shape_cast %0 : vector<16x8x32xf32> to vector<128x32xf32>
    %c0_2 = arith.constant 0 : index
    %c0_3 = arith.constant 0 : index
    %2 = vector.load %arg2[%c0_2, %c0_3] : memref<32x32xf32, #tpu.memory_space<vmem>>, vector<32x32xf32>
    %cst = arith.constant dense<0.000000e+00> : vector<128x32xf32>
    %3 = tpu.matmul %1, %2, %cst {dimension_numbers = #tpu.dot_dimension_numbers<[1], [0], [0], [1], [0, 0, 1, 1], [], []>} : vector<128x32xf32>, vector<32x32xf32>, vector<128x32xf32> -> vector<128x32xf32>
    %c0_4 = arith.constant 0 : index
    %c0_5 = arith.constant 0 : index
    %4 = vector.load %arg3[%c0_4, %c0_5] : memref<1x32xf32, #tpu.memory_space<vmem>>, vector<1x32xf32>
    %5 = vector.broadcast %4 : vector<1x32xf32> to vector<128x32xf32>
    %6 = arith.addf %3, %5 : vector<128x32xf32>
    %cst_6 = arith.constant 0.00999999977 : f32
    %7 = vector.broadcast %cst_6 : f32 to vector<128x32xf32>
    %8 = arith.mulf %7, %6 : vector<128x32xf32>
    %9 = arith.maximumf %6, %8 : vector<128x32xf32>
    %c0_7 = arith.constant 0 : index
    %c0_8 = arith.constant 0 : index
    %10 = vector.load %arg4[%c0_7, %c0_8] : memref<1x32xf32, #tpu.memory_space<vmem>>, vector<1x32xf32>
    %11 = vector.broadcast %10 : vector<1x32xf32> to vector<128x32xf32>
    %12 = arith.mulf %9, %11 : vector<128x32xf32>
    %13 = vector.shape_cast %12 : vector<128x32xf32> to vector<16x8x32xf32>
    %cst_9 = arith.constant dense<0.000000e+00> : vector<16x8xf32>
    %14 = vector.multi_reduction <add>, %13, %cst_9 [2] : vector<16x8x32xf32> to vector<16x8xf32>
    %cst_10 = arith.constant dense<0xFF800000> : vector<16xf32>
    %15 = vector.multi_reduction <maximumf>, %14, %cst_10 [1] : vector<16x8xf32> to vector<16xf32>
    %16 = vector.shape_cast %15 : vector<16xf32> to vector<16x1xf32>
    %17 = vector.broadcast %16 : vector<16x1xf32> to vector<16x8xf32>
    %18 = arith.subf %14, %17 : vector<16x8xf32>
    %19 = math.exp %18 : vector<16x8xf32>
    %cst_11 = arith.constant dense<0.000000e+00> : vector<16xf32>
    %20 = vector.multi_reduction <add>, %19, %cst_11 [1] : vector<16x8xf32> to vector<16xf32>
    %21 = vector.shape_cast %20 : vector<16xf32> to vector<16x1xf32>
    %22 = tpu.reciprocal %21 {approx = true} : vector<16x1xf32> -> vector<16x1xf32>
    %23 = arith.mulf %21, %22 : vector<16x1xf32>
    %cst_12 = arith.constant 2.000000e+00 : f32
    %24 = vector.broadcast %cst_12 : f32 to vector<16x1xf32>
    %25 = arith.subf %24, %23 : vector<16x1xf32>
    %26 = arith.mulf %22, %25 : vector<16x1xf32>
    %27 = vector.broadcast %26 : vector<16x1xf32> to vector<16x8xf32>
    %28 = arith.mulf %19, %27 : vector<16x8xf32>
    %c0_13 = arith.constant 0 : index
    %c0_14 = arith.constant 0 : index
    %c0_15 = arith.constant 0 : index
    %29 = vector.load %arg6[%c0_13, %c0_14, %c0_15] : memref<1x16x8xf32, #tpu.memory_space<vmem>>, vector<1x16x8xf32>
    %30 = vector.shape_cast %29 : vector<1x16x8xf32> to vector<16x8xf32>
    %31 = vector.shape_cast %28 : vector<16x8xf32> to vector<1x16x8xf32>
    tpu.vector_store %arg6[%c0_13, %c0_14, %c0_15], %31 {strides = array<i32>} : memref<1x16x8xf32, #tpu.memory_space<vmem>>, vector<1x16x8xf32>,
    %32 = vector.shape_cast %28 : vector<16x8xf32> to vector<16x8x1xf32>
    %33 = vector.broadcast %32 : vector<16x8x1xf32> to vector<16x8x32xf32>
    %34 = arith.mulf %33, %0 : vector<16x8x32xf32>
    %cst_16 = arith.constant dense<0.000000e+00> : vector<16x32xf32>
    %35 = vector.multi_reduction <add>, %34, %cst_16 [1] : vector<16x8x32xf32> to vector<16x32xf32>
    %c0_17 = arith.constant 0 : index
    %c0_18 = arith.constant 0 : index
    %c0_19 = arith.constant 0 : index
    %36 = vector.load %arg5[%c0_17, %c0_18, %c0_19] : memref<1x16x32xf32, #tpu.memory_space<vmem>>, vector<1x16x32xf32>
    %37 = vector.shape_cast %36 : vector<1x16x32xf32> to vector<16x32xf32>
    %38 = vector.shape_cast %35 : vector<16x32xf32> to vector<1x16x32xf32>
    tpu.vector_store %arg5[%c0_17, %c0_18, %c0_19], %38 {strides = array<i32>} : memref<1x16x32xf32, #tpu.memory_space<vmem>>, vector<1x16x32xf32>,
    return
  }
  func.func @transform_0(%arg0: i32) -> (i32, i32, i32) {
    %c0_i32 = arith.constant 0 : i32
    %c0_i32_0 = arith.constant 0 : i32
    %c0_i32_1 = arith.constant 0 : i32
    return %arg0, %c0_i32, %c0_i32_0 : i32, i32, i32
  }
  func.func @transform_1(%arg0: i32) -> (i32, i32) {
    %c0_i32 = arith.constant 0 : i32
    %c0_i32_0 = arith.constant 0 : i32
    %c0_i32_1 = arith.constant 0 : i32
    return %c0_i32, %c0_i32_0 : i32, i32
  }
  func.func @transform_2(%arg0: i32) -> (i32, i32) {
    %c0_i32 = arith.constant 0 : i32
    %c0_i32_0 = arith.constant 0 : i32
    %c0_i32_1 = arith.constant 0 : i32
    return %c0_i32, %c0_i32_0 : i32, i32
  }
  func.func @transform_3(%arg0: i32) -> (i32, i32) {
    %c0_i32 = arith.constant 0 : i32
    %c0_i32_0 = arith.constant 0 : i32
    %c0_i32_1 = arith.constant 0 : i32
    return %c0_i32, %c0_i32_0 : i32, i32
  }
  func.func @transform_4(%arg0: i32) -> (i32, i32, i32) {
    %c0_i32 = arith.constant 0 : i32
    %c0_i32_0 = arith.constant 0 : i32
    %c0_i32_1 = arith.constant 0 : i32
    return %arg0, %c0_i32, %c0_i32_0 : i32, i32, i32
  }
  func.func @transform_5(%arg0: i32) -> (i32, i32, i32) {
    %c0_i32 = arith.constant 0 : i32
    %c0_i32_0 = arith.constant 0 : i32
    %c0_i32_1 = arith.constant 0 : i32
    return %arg0, %c0_i32, %c0_i32_0 : i32, i32, i32
  }
}

</mosaic_0001>

<bundles_post_ra>
// kernel: tpu_custom_call.1
= control target key start
LH: loop header
LB: loop body
LE: loop exit
PB: predicated region body
PF: predicated region fallthrough
CT: control target
= control target key end

     0   :  { %11 = vsyncpa [#allocation3], 0  ;;  %s2194_s0 = inlined_call_operand.hbm [shape: f32[32,8,32], index: 0, kind: input, shape index: {}]   ;;  %s2195_s1 = inlined_call_operand.hbm [shape: f32[32,32], index: 1, kind: input, shape index: {}]   ;;  %s2196_s2 = inlined_call_operand.vmem [shape: f32[1,32], index: 2, kind: input, shape index: {}]   ;;  %s2197_s3 = inlined_call_operand.vmem [shape: f32[1,32], index: 3, kind: input, shape index: {}]   ;;  %s2198_s4 = inlined_call_operand.hbm [shape: f32[2,16,32], index: 4, kind: output, shape index: {0}]   ;;  %s2199_s5 = inlined_call_operand.vmem [shape: f32[2,16,8], index: 5, kind: output, shape index: {1}]  }
   0x1   :  { %13 = vsyncpa [#allocation3 + $0x1], 0 }
   0x2   :  { %14 = vsyncpa [#allocation6], 0 }
   0x3   :  { %15 = vsyncpa [#allocation4], 0 }
   0x4   :  { %17 = vsyncpa [#allocation4 + $0x1], 0  ;;  %s1550_s18 = smov 0   ;;  %s1552_s19 = smov 0  }
   0x5   :  { %s1554_s20 = smov 0   ;;  %s1556_s21 = smov 0  }
   0x6 LB: > { %s1571_s22 = sadd.s32 4294967295, %s1512_s21   ;;  %s1228_s23 = sadd.s32 4294967294, %s1512_s21   ;;  %s1512_s21 = sphi %s1556_s21, %s2211_s21   ;;  %s1508_s20 = sphi %s1554_s20, %s2210_s20   ;;  %s1504_s19 = sphi %s1552_s19, %s2209_s19   ;;  %s1500_s18 = sphi %s1550_s18, %s2208_s18  }
   0x7   : > { %p43_p0 = scmp.ne.s32.totalorder %s1504_s19, %s1500_s18  ;;  %p44_p1 = scmp.eq.s32.totalorder %s1571_s22, 0 }
   0x8   : > { %p130_p2 = scmp.eq.s32.totalorder %s1571_s22, 1  ;;  %p136_p3 = scmp.eq.s32.totalorder %s1228_s23, 1 }
   0x9   : > { %p1580_p4 = por %p44_p1, %p43_p0  ;;  %p1229_p5 = scmp.ge.s32.totalorder %s1512_s21, 1 }
   0xa   : > { %p1585_p6 = por %p136_p3, %p43_p0  ;;  %p169_p7 = scmp.lt.s32.totalorder %s1512_s21, 3 }
   0xb   : > { %s180_s28 = sshll.u32 %s2195_s1, 4  ;;  %s1514_s30 = smov [#allocation5]   ;;  %s181_s28 = int_to_ptr.hbm [resolvable:$true] %s180_s28 }
   0xc   : > { %p1593_p8 = pnand %p1229_p5, %p169_p7  ;;  %s182_s6 = sshll.u32 %s1514_s30, 4  ;;  %s183_s6 = int_to_ptr.vmem [resolvable:$true] %s182_s6 }
   0xd   : > { %s1603_s7 = sadd.s32 1, %s1512_s21   ;;  %s2200_s8 = smov 128  }
   0xe   : > { %p1285_p9 = pneg %p1593_p8  ;;  %s1516_s9 = smov 8  }
   0xf   : > { %s27_s10 = ssub.s32 %s1512_s21, %s1603_s7  ;;  %s30_s11 = sadd.s32 1, %s1508_s20 }
  0x10   : > { %p1286_p10 = pnand %p1285_p9, %p44_p1  ;;  %p28_p12 = scmp.eq.s32.totalorder %s27_s10, 0 }
  0x11   : > { %p37_p13 = scmp.ne.s32.totalorder %s1508_s20, %s1504_s19  ;;  %p38_p0 = scmp.eq.s32.totalorder %s1512_s21, 0 }
  0x12   : > { %1288 = dma.hbm_to_vmem [thread:$0]  (!%p1286_p10), %s181_s28, 512, %s183_s6, [#allocation6], %s2200_s8, %s2200_s8, %s1516_s9  }
  0x13   : > { %s1615_s12 = scalar_select %p28_p12, %s1508_s20, %s30_s11  }
  0x14   : > { %p1619_p3 = por %p130_p2, %p37_p13  ;;  %p1298_p5 = scmp.lt.s32.totalorder %s1512_s21, 2 }
  0x15   : > { %s202_s14 = sand.u32 1, %s1508_s20   ;;  %s1262_s15 = sshll.u32 %s1512_s21, 7 }
  0x16   : > { %p39_p7 = por %p38_p0, %p37_p13  ;;  %s1232_s16 = sshll.u32 %s202_s14, 7 }
  0x17   : > { %s211_s26 = scalar_lea.hbm %s2194_s0, %s1262_s15  ;;  %s206_s28 = scalar_lea.vmem [#allocation2], %s1232_s16 }
  0x18   : > { %s212_s27 = sshll.u32 %s211_s26, 4  ;;  %s214_s30 = sshll.u32 %s206_s28, 4  ;;  %s213_s27 = int_to_ptr.hbm [resolvable:$true] %s212_s27  ;;  %s215_s30 = int_to_ptr.vmem [resolvable:$true] %s214_s30 }
  0x19   : > { %p1629_p9 = pnand %p1298_p5, %p39_p7  ;;  %s203_s10 = scalar_lea.sflag [#allocation3], %s202_s14 }
  0x1a   : > { %s1412_s11 = sshra.s32 %s213_s27, 4  ;;  %s1419_s16 = scalar_lea.hbm %s2194_s0, 256  ;;  %s1413_s11 = int_to_ptr.hbm [resolvable:$true] %s1412_s11 }
  0x1b   : > { %s1414_s8 = scalar_lea.hbm %s1413_s11, 128  ;;  %p1416_p10 = pneg %p1629_p9 }
  0x1c   : > { %p1415_p2 = scmp.ne.s32.totalorder %s1413_s11, %s1414_s8  ;;  %p1420_p0 = scmp.lt.s32.totalorder %s1413_s11, %s2194_s0 }
  0x1d   : > { %p1421_p5 = scmp.lt.s32.totalorder %s1419_s16, %s1414_s8 }
  0x1e   : > { %p1417_p12 = pnand %p1416_p10, %p1415_p2 }
  0x1f   : > { %p1422_p7 = por %p1421_p5, %p1420_p0 }
  0x20   : > { %p1418_p13 = pneg %p1417_p12 }
  0x22   : > { %p1423_p11 = pnand %p1422_p7, %p1418_p13 }
  0x24   : > { %1426 = shalt.err (!%p1423_p11)
}
  0x25   : > { %s2206_s14 = smov 128   ;;  %226 = sbr.rel (%p1593_p8) target bundleno = 951 (0x3b7), region = 36 }
  0x26   : > { %1292 = dma.hbm_to_vmem [thread:$0]  (!%p1629_p9), %s213_s27, 2048, %s215_s30, %s203_s10, %s2206_s14, %s2206_s14, %s1516_s9  }
  0x27   : > { %s1649_s28 = sand.u32 (!%p1593_p8), 1, %s1504_s19  }
  0x28   : > { %s1236_s11 = sshll.u32 (!%p1593_p8), %s1649_s28, 7  ;;  %s229_s8 = scalar_lea.sflag (!%p1593_p8), [#allocation3], %s1649_s28 }
  0x29   : > { %s1653_s15 = scalar_lea.vmem (!%p1593_p8), [#allocation2], %s1236_s11 }
  0x2a   : > { %1487 = dma.done.wait (%p1580_p4), %s229_s8, 2048  }
  0x2b   : > { %1489 = vsyncadd (%p1580_p4), %s229_s8, 4294965248 }
  0x2c   : > { %1491 = dma.done.wait (%p44_p1), [#allocation6], 512  }
  0x2d   : > { %1493 = vsyncadd (%p44_p1), [#allocation6], 4294966784  ;;  %v295_v0 = vld [vmem:[#allocation5 + $0x18] sm:$0xff]  ;;  %v294_v1 = vld [vmem:[#allocation5 + $0x10] sm:$0xff]  ;;  %vm300_vm0 = vcmask 261120   ;;  %vm548_vm1 = vcmask 1041409  }
  0x2e   : > { %361 = vmatpush.msra.mxu0 %v295_v0  ;;  %1266 = vmatpush.msra.mxu2 %v295_v0  ;;  %v293_v2 = vld [vmem:[#allocation5 + $0x8] sm:$0xff]  ;;  %v292_v3 = vld [vmem:[#allocation5] sm:$0xff]  ;;  %v1701_v12 = vld [vmem:[%s1653_s15 + $0x50] sm:$0xff]  ;;  %vm550_vm2 = vcmask 1042434   ;;  %vm552_vm3 = vcmask 1043459   ;;  %vm554_vm4 = vcmask 1044484  }
  0x2f   : > { %1267 = vmatpush.msra.mxu3 %v295_v0  ;;  %1265 = vmatpush.msra.mxu1 %v295_v0  ;;  %v1664_v4 = vld [vmem:[%s1653_s15] sm:$0xff]  ;;  %v1684_v8 = vld [vmem:[%s1653_s15 + $0x48] sm:$0xff]  ;;  %v1704_v13 = vld [vmem:[%s1653_s15 + $0x10] sm:$0xff]  ;;  %vm556_vm5 = vcmask 1045509   ;;  %vm558_vm6 = vcmask 1046534   ;;  %vm560_vm7 = vcmask 1047559  }
  0x30   : > { %362 = vmatpush.msra.mxu0 %v294_v1  ;;  %1269 = vmatpush.msra.mxu2 %v294_v1  ;;  %v1667_v5 = vld [vmem:[%s1653_s15 + $0x40] sm:$0xff]  ;;  %v1687_v9 = vld [vmem:[%s1653_s15 + $0x8] sm:$0xff]  ;;  %v1707_v14 = vld [vmem:[%s1653_s15 + $0x30] sm:$0xff]  ;;  %vm571_vm8 = vcmask 64512   ;;  %p271_p1 = scmp.lt.s32.totalorder %s1571_s22, 1  ;;  %s1238_s23 = sshll.u32 %s1649_s28, 4 }
  0x31   : > { %1270 = vmatpush.msra.mxu3 %v294_v1  ;;  %1268 = vmatpush.msra.mxu1 %v294_v1  ;;  %v1670_v6 = vld [vmem:[%s1653_s15 + $0x60] sm:$0xff]  ;;  %v1690_v10 = vld [vmem:[%s1653_s15 + $0x28] sm:$0xff]  ;;  %v1710_v15 = vld [vmem:[%s1653_s15 + $0x70] sm:$0xff]  ;;  %s1264_s26 = sshll.u32 %s1571_s22, 4  ;;  %s262_s8 = scalar_lea.vmem [#allocation7], %s1238_s23 }
  0x32   : > { %363 = vmatpush.msra.mxu0 %v293_v2  ;;  %1272 = vmatpush.msra.mxu2 %v293_v2  ;;  %v1673_v7 = vld [vmem:[%s1653_s15 + $0x20] sm:$0xff]  ;;  %v289_v11 = vld [vmem:[%s1653_s15 + $0x68] sm:$0xff]  ;;  %v1721_v16 = vld [vmem:[%s1653_s15 + $0x58] sm:$0xff]  ;;  %s2083_s30 = scalar_select %p271_p1, %s1571_s22, 1 }
  0x33   : > { %1273 = vmatpush.msra.mxu3 %v293_v2  ;;  %1271 = vmatpush.msra.mxu1 %v293_v2  ;;  %v1724_v17 = vld [vmem:[%s1653_s15 + $0x18] sm:$0xff]  ;;  %v1740_v20 = vld [vmem:[%s2196_s2] ss:$0 sm:$0xff]  ;;  %s1113_s11 = scalar_lea.hbm %s2198_s4, %s1264_s26  ;;  %s1097_s29 = scalar_lea.sflag [#allocation4], %s1649_s28 }
  0x34   : > { %364 = vmatpush.msra.mxu0 %v292_v3  ;;  %1275 = vmatpush.msra.mxu2 %v292_v3  ;;  %v1727_v18 = vld [vmem:[%s1653_s15 + $0x78] sm:$0xff]  ;;  %v1747_v26 = vld [vmem:[%s2197_s3] ss:$0 sm:$0xff]  ;;  %s1263_s6 = sshll.u32 %s2083_s30, 4  ;;  %s1116_s24 = sshll.u32 %s1113_s11, 4  ;;  %s1117_s24 = int_to_ptr.hbm [resolvable:$true] %s1116_s24 }
  0x35   : > { %1241 = vmatmul.msk.f32.vlgmr.msra.gmra.mxu0 %vm300_vm0, %v1664_v4  ;;  %1249 = vmatmul.msk.f32.vlgmr.msra.gmra.mxu2 %vm300_vm0, %v1667_v5  ;;  %v283_v19 = vld [vmem:[%s1653_s15 + $0x38] sm:$0xff]  ;;  %s2109_s16 = scalar_lea.vmem %s2199_s5, %s1263_s6  ;;  %s1456_s9 = sshra.s32 %s1117_s24, 4  ;;  %s1457_s9 = int_to_ptr.hbm [resolvable:$true] %s1456_s9 }
  0x36   : > { %1276 = vmatpush.msra.mxu3 %v292_v3  ;;  %1274 = vmatpush.msra.mxu1 %v292_v3  ;;  %s1458_s27 = scalar_lea.hbm %s1457_s9, 16  ;;  %s1462_s10 = scalar_lea.hbm %s2198_s4, 32 }
  0x37   : > { %1253 = vmatmul.msk.f32.vlgmr.msra.gmra.mxu3 %vm300_vm0, %v1670_v6  ;;  %1245 = vmatmul.msk.f32.vlgmr.msra.gmra.mxu1 %vm300_vm0, %v1673_v7  ;;  %p1459_p4 = scmp.ne.s32.totalorder %s1457_s9, %s1458_s27  ;;  %p1463_p9 = scmp.lt.s32.totalorder %s1457_s9, %s2198_s4 }
  0x38   : > { %p1464_p2 = scmp.lt.s32.totalorder %s1462_s10, %s1458_s27 }
  0x39   : > { %p1460_p8 = pnand %p1459_p4, %p1619_p3 }
  0x3a   : > { %p1465_p10 = por %p1464_p2, %p1463_p9 }
  0x3b   : > { %p1461_p11 = pneg %p1460_p8 }
  0x3d   : > { %1250 = vmatmul.msk.f32.gmra.mxu2 %vm300_vm0, %v1684_v8  ;;  %1242 = vmatmul.msk.f32.gmra.mxu0 %vm300_vm0, %v1687_v9  ;;  %p1466_p12 = pnand %p1465_p10, %p1461_p11 }
  0x3f   : > { %1246 = vmatmul.msk.f32.gmra.mxu1 %vm300_vm0, %v1690_v10  ;;  %1254 = vmatmul.msk.f32.gmra.mxu3 %vm300_vm0, %v289_v11 }
  0x45   : > { %1251 = vmatmul.msk.f32.gmra.mxu2 %vm300_vm0, %v1701_v12  ;;  %1243 = vmatmul.msk.f32.gmra.mxu0 %vm300_vm0, %v1704_v13 }
  0x47   : > { %1247 = vmatmul.msk.f32.gmra.mxu1 %vm300_vm0, %v1707_v14  ;;  %1255 = vmatmul.msk.f32.gmra.mxu3 %vm300_vm0, %v1710_v15 }
  0x4d   : > { %1252 = vmatmul.msk.f32.gmra.mxu2 %vm300_vm0, %v1721_v16  ;;  %1244 = vmatmul.msk.f32.gmra.mxu0 %vm300_vm0, %v1724_v17 }
  0x4f   : > { %1256 = vmatmul.msk.f32.gmra.mxu3 %vm300_vm0, %v1727_v18  ;;  %1248 = vmatmul.msk.f32.gmra.mxu1 %vm300_vm0, %v283_v19 }
  0xb2   : > { %v366_v21 = vpop.f32.mrf.mxu0 }
  0xb3   : > { %v367_v22 = vadd.f32 %v1740_v20, %v366_v21 }
  0xb4   : > { %v378_v23 = vpop.f32.mrf.mxu1 }
  0xb5   : > { %v414_v24 = vmul.f32 0.01, %v367_v22  ;;  %v379_v25 = vadd.f32 %v1740_v20, %v378_v23 }
  0xb7   : > { %v430_v27 = vmax.f32 %v367_v22, %v414_v24  ;;  %v418_v28 = vmul.f32 0.01, %v379_v25 }
  0xb8   : > { %v390_v29 = vpop.f32.mrf.mxu2 }
  0xb9   : > { %v434_v30 = vmax.f32 %v379_v25, %v418_v28  ;;  %v391_v31 = vadd.f32 %v1740_v20, %v390_v29  ;;  %v450_v32 = vmul.f32 %v1747_v26, %v430_v27 }
  0xba   : > { %v402_v33 = vpop.f32.mrf.mxu3  ;;  %v369_v34 = vpop.f32.mrf.mxu0 }
  0xbb   : > { %v422_v35 = vmul.f32 0.01, %v391_v31  ;;  %v403_v36 = vadd.f32 %v1740_v20, %v402_v33  ;;  %v466_v37 = vsel %vm300_vm0, %v450_v32, 0.0  ;;  %v454_v38 = vmul.f32 %v1747_v26, %v434_v30 }
  0xbc   : > { %467 = vadd.xlane.f32.xlu0 %v466_v37  ;;  %v381_v39 = vpop.f32.mrf.mxu1  ;;  %v370_v40 = vadd.f32 %v1740_v20, %v369_v34 }
  0xbd   : > { %v438_v41 = vmax.f32 %v391_v31, %v422_v35  ;;  %v426_v42 = vmul.f32 0.01, %v403_v36  ;;  %v382_v43 = vadd.f32 %v1740_v20, %v381_v39  ;;  %v478_v44 = vsel %vm300_vm0, %v454_v38, 0.0 }
  0xbe   : > { %479 = vadd.xlane.f32.xlu2 %v478_v44  ;;  %v415_v45 = vmul.f32 0.01, %v370_v40 }
  0xbf   : > { %v442_v46 = vmax.f32 %v403_v36, %v426_v42  ;;  %v419_v47 = vmul.f32 0.01, %v382_v43  ;;  %v458_v48 = vmul.f32 %v1747_v26, %v438_v41 }
  0xc0   : > { %v393_v49 = vpop.f32.mrf.mxu2  ;;  %v431_v50 = vmax.f32 %v370_v40, %v415_v45 }
  0xc1   : > { %v435_v51 = vmax.f32 %v382_v43, %v419_v47  ;;  %v394_v52 = vadd.f32 %v1740_v20, %v393_v49  ;;  %v490_v53 = vsel %vm300_vm0, %v458_v48, 0.0  ;;  %v462_v54 = vmul.f32 %v1747_v26, %v442_v46 }
  0xc2   : > { %491 = vadd.xlane.f32.xlu1 %v490_v53  ;;  %v405_v55 = vpop.f32.mrf.mxu3  ;;  %v372_v56 = vpop.f32.mrf.mxu0  ;;  %v451_v63 = vmul.f32 %v1747_v26, %v431_v50 }
  0xc3   : > { %v423_v57 = vmul.f32 0.01, %v394_v52  ;;  %v502_v58 = vsel %vm300_vm0, %v462_v54, 0.0  ;;  %v406_v59 = vadd.f32 %v1740_v20, %v405_v55  ;;  %v373_v60 = vadd.f32 %v1740_v20, %v372_v56 }
  0xc4   : > { %503 = vadd.xlane.f32.xlu0 %v502_v58  ;;  %v384_v61 = vpop.f32.mrf.mxu1  ;;  %v455_v62 = vmul.f32 %v1747_v26, %v435_v51  ;;  %v469_v29 = vsel %vm300_vm0, %v451_v63, 0.0 }
  0xc5   : > { %v439_v0 = vmax.f32 %v394_v52, %v423_v57  ;;  %v427_v1 = vmul.f32 0.01, %v406_v59  ;;  %v416_v2 = vmul.f32 0.01, %v373_v60  ;;  %v385_v3 = vadd.f32 %v1740_v20, %v384_v61 }
  0xc6   : > { %v481_v21 = vsel %vm300_vm0, %v455_v62, 0.0 }
  0xc7   : > { %v432_v11 = vmax.f32 %v373_v60, %v416_v2  ;;  %v420_v19 = vmul.f32 0.01, %v385_v3  ;;  %v459_v22 = vmul.f32 %v1747_v26, %v439_v0  ;;  %v443_v23 = vmax.f32 %v406_v59, %v427_v1 }
  0xc8   : > { %v396_v24 = vpop.f32.mrf.mxu2 }
  0xc9   : > { %v397_v25 = vadd.f32 %v1740_v20, %v396_v24  ;;  %v436_v27 = vmax.f32 %v385_v3, %v420_v19  ;;  %v493_v28 = vsel %vm300_vm0, %v459_v22, 0.0  ;;  %v452_v33 = vmul.f32 %v1747_v26, %v432_v11 }
  0xca   : > { %482 = vadd.xlane.f32.xlu1 %v481_v21  ;;  %494 = vadd.xlane.f32.xlu2 %v493_v28  ;;  %v408_v30 = vpop.f32.mrf.mxu3  ;;  %v375_v31 = vpop.f32.mrf.mxu0  ;;  %v463_v34 = vmul.f32 %v1747_v26, %v443_v23 }
  0xcb   : > { %v376_v32 = vadd.f32 %v1740_v20, %v375_v31  ;;  %v424_v35 = vmul.f32 0.01, %v397_v25  ;;  %v456_v37 = vmul.f32 %v1747_v26, %v436_v27  ;;  %v409_v39 = vadd.f32 %v1740_v20, %v408_v30 }
  0xcc   : > { %470 = vadd.xlane.f32.xlu0 %v469_v29  ;;  %v387_v38 = vpop.f32.mrf.mxu1  ;;  %v472_v40 = vsel %vm300_vm0, %v452_v33, 0.0  ;;  %v505_v42 = vsel %vm300_vm0, %v463_v34, 0.0  ;;  %v530_v27 = vlaneseq }
  0xcd   : > { %v417_v36 = vmul.f32 0.01, %v376_v32  ;;  %v388_v43 = vadd.f32 %v1740_v20, %v387_v38  ;;  %v440_v44 = vmax.f32 %v397_v25, %v424_v35  ;;  %v484_v47 = vsel %vm300_vm0, %v456_v37, 0.0 }
  0xce   : > { %v428_v50 = vmul.f32 0.01, %v409_v39  ;;  %v1811_v31 = vand.u32 127, %v530_v27  ;;  %v1517_v27 = vmov 0  }
  0xcf   : > { %v433_v46 = vmax.f32 %v376_v32, %v417_v36  ;;  %v421_v52 = vmul.f32 0.01, %v388_v43  ;;  %v460_v55 = vmul.f32 %v1747_v26, %v440_v44  ;;  %1341 = vset.pattern.permute.xlu2 %v1517_v27  ;;  %1340 = vset.pattern.permute.xlu1 %v1517_v27 }
  0xd0   : > { %v399_v41 = vpop.f32.mrf.mxu2  ;;  %v444_v57 = vmax.f32 %v409_v39, %v428_v50  ;;  %1339 = vset.pattern.permute.xlu0 %v1517_v27 }
  0xd1   : > { %v400_v45 = vadd.f32 %v1740_v20, %v399_v41  ;;  %v453_v56 = vmul.f32 %v1747_v26, %v433_v46  ;;  %v437_v59 = vmax.f32 %v388_v43, %v421_v52  ;;  %v496_v61 = vsel %vm300_vm0, %v460_v55, 0.0 }
  0xd2   : > { %506 = vadd.xlane.f32.xlu2 %v505_v42  ;;  %473 = vadd.xlane.f32.xlu1 %v472_v40  ;;  %v411_v48 = vpop.f32.mrf.mxu3 }
  0xd3   : > { %v425_v49 = vmul.f32 0.01, %v400_v45  ;;  %v412_v51 = vadd.f32 %v1740_v20, %v411_v48  ;;  %v475_v63 = vsel %vm300_vm0, %v453_v56, 0.0  ;;  %v464_v20 = vmul.f32 %v1747_v26, %v444_v57 }
  0xd4   : > { %485 = vadd.xlane.f32.xlu0 %v484_v47  ;;  %v457_v0 = vmul.f32 %v1747_v26, %v437_v59 }
  0xd5   : > { %v441_v53 = vmax.f32 %v400_v45, %v425_v49  ;;  %v429_v54 = vmul.f32 0.01, %v412_v51  ;;  %v508_v2 = vsel %vm300_vm0, %v464_v20, 0.0 }
  0xd6   : > { %v487_v3 = vsel %vm300_vm0, %v457_v0, 0.0 }
  0xd7   : > { %v461_v58 = vmul.f32 %v1747_v26, %v441_v53  ;;  %v445_v60 = vmax.f32 %v412_v51, %v429_v54 }
  0xd9   : > { %v499_v62 = vsel %vm300_vm0, %v461_v58, 0.0  ;;  %v465_v1 = vmul.f32 %v1747_v26, %v445_v60 }
  0xda   : > { %497 = vadd.xlane.f32.xlu2 %v496_v61  ;;  %500 = vadd.xlane.f32.xlu1 %v499_v62 }
  0xdb   : > { %v511_v11 = vsel %vm300_vm0, %v465_v1, 0.0 }
  0xdc   : > { %476 = vadd.xlane.f32.xlu0 %v475_v63 }
  0xe2   : > { %488 = vadd.xlane.f32.xlu2 %v487_v3  ;;  %509 = vadd.xlane.f32.xlu1 %v508_v2 }
  0xe4   : > { %512 = vadd.xlane.f32.xlu0 %v511_v11 }
 0x12f   : > { %v1795_v19 = vpop.xlane.xlu0 %467 }
 0x130   : > { %v532_v38 = vperm.slane %v1795_v19, %v1811_v31 }
 0x131   : > { %v1797_v21 = vpop.xlane.xlu2 %479 }
 0x132   : > { %v536_v46 = vperm.slane %v1797_v21, %v1811_v31 }
 0x135   : > { %v1799_v22 = vpop.xlane.xlu1 %491 }
 0x136   : > { %v540_v34 = vperm.slane %v1799_v22, %v1811_v31 }
 0x137   : > { %v1801_v23 = vpop.xlane.xlu0 %503 }
 0x138   : > { %v544_v49 = vperm.slane %v1801_v23, %v1811_v31 }
 0x13d   : > { %v1803_v24 = vpop.xlane.xlu1 %482  ;;  %v1805_v26 = vpop.xlane.xlu2 %494 }
 0x13e   : > { %v541_v32 = vperm.slane %v1805_v26, %v1811_v31  ;;  %v537_v50 = vperm.slane %v1803_v24, %v1811_v31 }
 0x13f   : > { %v471_v25 = vpop.xlane.xlu0 %470 }
 0x140   : > { %v533_v33 = vperm.slane %v471_v25, %v1811_v31  ;;  %v562_v41 = vsel %vm548_vm1, %v541_v32, %v540_v34 }
 0x142   : > { %v549_v43 = vsel %vm548_vm1, %v533_v33, %v532_v38 }
 0x145   : > { %v1807_v28 = vpop.xlane.xlu2 %506  ;;  %v474_v29 = vpop.xlane.xlu1 %473 }
 0x146   : > { %v534_v35 = vperm.slane %v474_v29, %v1811_v31  ;;  %v545_v55 = vperm.slane %v1807_v28, %v1811_v31 }
 0x147   : > { %v1809_v30 = vpop.xlane.xlu0 %485 }
 0x148   : > { %v551_v47 = vsel %vm550_vm2, %v534_v35, %v549_v43  ;;  %v538_v56 = vperm.slane %v1809_v30, %v1811_v31 }
 0x14d   : > { %v1819_v36 = vpop.xlane.xlu2 %497  ;;  %v1821_v37 = vpop.xlane.xlu1 %500 }
 0x14e   : > { %v542_v39 = vperm.slane %v1819_v36, %v1811_v31  ;;  %v543_v40 = vperm.slane %v1821_v37, %v1811_v31 }
 0x14f   : > { %v477_v42 = vpop.xlane.xlu0 %476 }
 0x150   : > { %v563_v44 = vsel %vm550_vm2, %v542_v39, %v562_v41  ;;  %v535_v45 = vperm.slane %v477_v42, %v1811_v31 }
 0x151   : > { %v564_v48 = vsel %vm552_vm3, %v543_v40, %v563_v44 }
 0x152   : > { %v553_v51 = vsel %vm552_vm3, %v535_v45, %v551_v47  ;;  %v565_v54 = vsel %vm554_vm4, %v544_v49, %v564_v48 }
 0x153   : > { %v555_v52 = vsel %vm554_vm4, %v536_v46, %v553_v51  ;;  %v566_v63 = vsel %vm556_vm5, %v545_v55, %v565_v54 }
 0x154   : > { %v557_v53 = vsel %vm556_vm5, %v537_v50, %v555_v52 }
 0x155   : > { %v489_v57 = vpop.xlane.xlu2 %488  ;;  %v1849_v58 = vpop.xlane.xlu1 %509  ;;  %v559_v62 = vsel %vm558_vm6, %v538_v56, %v557_v53 }
 0x156   : > { %v539_v59 = vperm.slane %v489_v57, %v1811_v31  ;;  %v546_v60 = vperm.slane %v1849_v58, %v1811_v31 }
 0x157   : > { %v1854_v61 = vpop.xlane.xlu0 %512 }
 0x158   : > { %v547_v20 = vperm.slane %v1854_v61, %v1811_v31  ;;  %v561_v0 = vsel %vm560_vm7, %v539_v59, %v559_v62  ;;  %v567_v1 = vsel %vm558_vm6, %v546_v60, %v566_v63 }
 0x159   : > { %v572_v2 = vsel %vm571_vm8, %v561_v0, -inf }
 0x15a   : > { %573 = vmax.xlane.f32.xlu1 %v572_v2  ;;  %v568_v3 = vsel %vm560_vm7, %v547_v20, %v567_v1 }
 0x15b   : > { %v575_v11 = vsel %vm571_vm8, %v568_v3, -inf }
 0x15c   : > { %576 = vmax.xlane.f32.xlu2 %v575_v11 }
 0x1cd   : > { %v574_v32 = vpop.xlane.xlu1 %573 }
 0x1ce   : > { %v581_v33 = vperm.slane %v574_v32, 1  ;;  %v580_v34 = vperm.slane %v574_v32, 0  ;;  %v582_v35 = vperm.slane %v574_v32, 2  ;;  %v584_v41 = vperm.slane %v574_v32, 4 }
 0x1cf   : > { %v587_v43 = vperm.slane %v574_v32, 7  ;;  %v583_v44 = vperm.slane %v574_v32, 3  ;;  %v1867_v50 = vpop.xlane.xlu2 %576  ;;  %v585_v55 = vperm.slane %v574_v32, 5 }
 0x1d0   : > { %v613_v38 = vsub.f32 %v471_v25, %v581_v33  ;;  %v612_v39 = vsub.f32 %v1795_v19, %v580_v34  ;;  %v614_v40 = vsub.f32 %v474_v29, %v582_v35  ;;  %v616_v48 = vsub.f32 %v1797_v21, %v584_v41 }
 0x1d1   : > { %v619_v49 = vsub.f32 %v489_v57, %v587_v43  ;;  %v615_v51 = vsub.f32 %v477_v42, %v583_v44  ;;  %v586_v25 = vperm.slane %v574_v32, 6  ;;  %v590_v19 = vperm.slane %v1867_v50, 2 }
 0x1d2   : > { %v630_v45 = vmul.f32 1.442695, %v613_v38  ;;  %v628_v46 = vmul.f32 1.442695, %v612_v39  ;;  %v632_v47 = vmul.f32 1.442695, %v614_v40  ;;  %v617_v59 = vsub.f32 %v1803_v24, %v585_v55 }
 0x1d3   : > { %v636_v52 = vmul.f32 1.442695, %v616_v48  ;;  %v642_v53 = vmul.f32 1.442695, %v619_v49  ;;  %v634_v54 = vmul.f32 1.442695, %v615_v51  ;;  %v618_v42 = vsub.f32 %v1809_v30, %v586_v25 }
 0x1d4   : > { %1344 = vpow2.f32 %v630_v45  ;;  %v622_v57 = vsub.f32 %v1819_v36, %v590_v19  ;;  %v589_v62 = vperm.slane %v1867_v50, 1  ;;  %v593_v20 = vperm.slane %v1867_v50, 5 }
 0x1d5   : > { %1346 = vpow2.f32 %v628_v46  ;;  %v640_v60 = vmul.f32 1.442695, %v618_v42  ;;  %v638_v1 = vmul.f32 1.442695, %v617_v59  ;;  %v588_v2 = vperm.slane %v1867_v50, 0 }
 0x1d6   : > { %1348 = vpow2.f32 %v632_v47  ;;  %v648_v63 = vmul.f32 1.442695, %v622_v57  ;;  %v621_v24 = vsub.f32 %v1805_v26, %v589_v62  ;;  %v625_v36 = vsub.f32 %v1807_v28, %v593_v20 }
 0x1d7   : > { %1350 = vpow2.f32 %v636_v52  ;;  %v620_v11 = vsub.f32 %v1799_v22, %v588_v2  ;;  %v592_v32 = vperm.slane %v1867_v50, 4  ;;  %v591_v38 = vperm.slane %v1867_v50, 3 }
 0x1d8   : > { %1352 = vpow2.f32 %v642_v53  ;;  %v646_v27 = vmul.f32 1.442695, %v621_v24  ;;  %v654_v33 = vmul.f32 1.442695, %v625_v36  ;;  %v595_v41 = vperm.slane %v1867_v50, 7 }
 0x1d9   : > { %1354 = vpow2.f32 %v634_v54  ;;  %v644_v35 = vmul.f32 1.442695, %v620_v11  ;;  %v624_v22 = vsub.f32 %v1801_v23, %v592_v32  ;;  %v623_v28 = vsub.f32 %v1821_v37, %v591_v38 }
 0x1da   : > { %v1870_v29 = vpop.eup %1344  ;;  %1356 = vpow2.f32 %v640_v60  ;;  %v594_v45 = vperm.slane %v1867_v50, 6  ;;  %v627_v23 = vsub.f32 %v1854_v61, %v595_v41 }
 0x1db   : > { %v1872_v56 = vpop.eup %1346  ;;  %680 = vperm.xlu1 %1340, %v1870_v29   ;;  %1358 = vpow2.f32 %v648_v63  ;;  %v652_v40 = vmul.f32 1.442695, %v624_v22  ;;  %v650_v44 = vmul.f32 1.442695, %v623_v28 }
 0x1dc   : > { %v1875_v21 = vpop.eup %1348  ;;  %677 = vperm.xlu0 %1339, %v1872_v56   ;;  %1360 = vpow2.f32 %v638_v1  ;;  %v626_v37 = vsub.f32 %v1849_v58, %v594_v45  ;;  %v658_v48 = vmul.f32 1.442695, %v627_v23 }
 0x1dd   : > { %683 = vperm.xlu2 %1341, %v1875_v21   ;;  %v1884_v0 = vpop.eup %1350  ;;  %1362 = vpow2.f32 %v646_v27 }
 0x1de   : > { %v1887_v30 = vpop.eup %1352  ;;  %1364 = vpow2.f32 %v654_v33  ;;  %v656_v50 = vmul.f32 1.442695, %v626_v37 }
 0x1df   : > { %v1890_v3 = vpop.eup %1354  ;;  %1366 = vpow2.f32 %v644_v35 }
 0x1e0   : > { %v1898_v34 = vpop.eup %1356  ;;  %1368 = vpow2.f32 %v652_v40 }
 0x1e1   : > { %v1901_v39 = vpop.eup %1358  ;;  %1370 = vpow2.f32 %v650_v44 }
 0x1e2   : > { %v1904_v26 = vpop.eup %1360  ;;  %1372 = vpow2.f32 %v658_v48 }
 0x1e3   : > { %689 = vperm.xlu1 %1340, %v1884_v0   ;;  %v1911_v43 = vpop.eup %1362  ;;  %1374 = vpow2.f32 %v656_v50 }
 0x1e4   : > { %698 = vperm.xlu0 %1339, %v1887_v30   ;;  %v1914_v46 = vpop.eup %1364 }
 0x1e5   : > { %686 = vperm.xlu2 %1341, %v1890_v3   ;;  %v1917_v47 = vpop.eup %1366 }
 0x1e6   : > { %v1923_v49 = vpop.eup %1368 }
 0x1e7   : > { %v1926_v51 = vpop.eup %1370 }
 0x1e8   : > { %v1929_v52 = vpop.eup %1372 }
 0x1e9   : > { %v1932_v61 = vpop.eup %1374 }
 0x1eb   : > { %695 = vperm.xlu1 %1340, %v1898_v34  }
 0x1ec   : > { %707 = vperm.xlu0 %1339, %v1901_v39  }
 0x1ed   : > { %692 = vperm.xlu2 %1341, %v1904_v26  }
 0x1f3   : > { %704 = vperm.xlu1 %1340, %v1911_v43  }
 0x1f4   : > { %716 = vperm.xlu0 %1339, %v1914_v46  }
 0x1f5   : > { %701 = vperm.xlu2 %1341, %v1917_v47  }
 0x1fb   : > { %713 = vperm.xlu1 %1340, %v1923_v49  }
 0x1fd   : > { %710 = vperm.xlu2 %1341, %v1926_v51  }
 0x203   : > { %722 = vperm.xlu1 %1340, %v1929_v52  }
 0x205   : > { %719 = vperm.xlu2 %1341, %v1932_v61  }
 0x237   : > { %v684_v58 = vpop.permute.xlu2 %683 }
 0x238   : > { %v726_v60 = vperm.slane %v684_v58, %v1811_v31 }
 0x23f   : > { %v687_v25 = vpop.permute.xlu2 %686 }
 0x240   : > { %v727_v20 = vperm.slane %v687_v25, %v1811_v31 }
 0x247   : > { %v693_v42 = vpop.permute.xlu2 %692 }
 0x248   : > { %v729_v36 = vperm.slane %v693_v42, %v1811_v31 }
 0x24d   : > { %v681_v53 = vpop.permute.xlu1 %680 }
 0x24e   : > { %v678_v19 = vpop.permute.xlu0 %677  ;;  %v725_v54 = vperm.slane %v681_v53, %v1811_v31 }
 0x24f   : > { %v724_v55 = vperm.slane %v678_v19, %v1811_v31  ;;  %v702_v27 = vpop.permute.xlu2 %701 }
 0x250   : > { %v732_v45 = vperm.slane %v702_v27, %v1811_v31 }
 0x251   : > { %v740_v57 = vsel %vm548_vm1, %v725_v54, %v724_v55 }
 0x252   : > { %v741_v62 = vsel %vm550_vm2, %v726_v60, %v740_v57 }
 0x253   : > { %v742_v1 = vsel %vm552_vm3, %v727_v20, %v741_v62 }
 0x255   : > { %v690_v59 = vpop.permute.xlu1 %689 }
 0x256   : > { %v728_v63 = vperm.slane %v690_v59, %v1811_v31  ;;  %v699_v2 = vpop.permute.xlu0 %698 }
 0x257   : > { %v731_v33 = vperm.slane %v699_v2, %v1811_v31  ;;  %v711_v23 = vpop.permute.xlu2 %710 }
 0x258   : > { %v743_v24 = vsel %vm554_vm4, %v728_v63, %v742_v1  ;;  %v735_v25 = vperm.slane %v711_v23, %v1811_v31 }
 0x259   : > { %v744_v35 = vsel %vm556_vm5, %v729_v36, %v743_v24 }
 0x25d   : > { %v696_v11 = vpop.permute.xlu1 %695 }
 0x25e   : > { %v730_v32 = vperm.slane %v696_v11, %v1811_v31  ;;  %v708_v40 = vpop.permute.xlu0 %707 }
 0x25f   : > { %v734_v48 = vperm.slane %v708_v40, %v1811_v31  ;;  %v720_v42 = vpop.permute.xlu2 %719 }
 0x260   : > { %v745_v38 = vsel %vm558_vm6, %v730_v32, %v744_v35  ;;  %v738_v60 = vperm.slane %v720_v42, %v1811_v31 }
 0x261   : > { %v746_v22 = vsel %vm560_vm7, %v731_v33, %v745_v38 }
 0x262   : > { %v756_v28 = vsel %vm571_vm8, %v746_v22, 0.0 }
 0x263   : > { %757 = vadd.xlane.f32.xlu0 %v756_v28 }
 0x265   : > { %v705_v41 = vpop.permute.xlu1 %704 }
 0x266   : > { %v733_v44 = vperm.slane %v705_v41, %v1811_v31  ;;  %v717_v19 = vpop.permute.xlu0 %716 }
 0x267   : > { %v737_v57 = vperm.slane %v717_v19, %v1811_v31 }
 0x268   : > { %v747_v37 = vsel %vm548_vm1, %v733_v44, %v732_v45 }
 0x269   : > { %v748_v50 = vsel %vm550_vm2, %v734_v48, %v747_v37 }
 0x26a   : > { %v749_v54 = vsel %vm552_vm3, %v735_v25, %v748_v50 }
 0x26d   : > { %v714_v58 = vpop.permute.xlu1 %713 }
 0x26e   : > { %v736_v53 = vperm.slane %v714_v58, %v1811_v31 }
 0x270   : > { %v750_v55 = vsel %vm554_vm4, %v736_v53, %v749_v54 }
 0x271   : > { %v751_v59 = vsel %vm556_vm5, %v737_v57, %v750_v55 }
 0x272   : > { %v752_v20 = vsel %vm558_vm6, %v738_v60, %v751_v59 }
 0x275   : > { %v723_v62 = vpop.permute.xlu1 %722 }
 0x276   : > { %v739_v63 = vperm.slane %v723_v62, %v1811_v31 }
 0x278   : > { %v753_v1 = vsel %vm560_vm7, %v739_v63, %v752_v20 }
 0x279   : > { %v759_v2 = vsel %vm571_vm8, %v753_v1, 0.0 }
 0x27a   : > { %760 = vadd.xlane.f32.xlu2 %v759_v2 }
 0x2d6   : > { %v758_v24 = vpop.xlane.xlu0 %757 }
 0x2d7   : > { %1376 = vrcp.f32 %v758_v24 }
 0x2dd   : > { %v1377_v36 = vpop.eup %1376 }
 0x2de   : > { %v764_v11 = vmul.f32 %v1377_v36, %v758_v24 }
 0x2e0   : > { %v766_v27 = vsub.f32 2.0, %v764_v11 }
 0x2e2   : > { %v768_v32 = vmul.f32 %v1377_v36, %v766_v27 }
 0x2e4   : > { %v778_v33 = vperm.slane %v768_v32, 6  ;;  %v772_v35 = vperm.slane %v768_v32, 0  ;;  %v773_v28 = vperm.slane %v768_v32, 1  ;;  %v774_v44 = vperm.slane %v768_v32, 2 }
 0x2e5   : > { %v775_v58 = vperm.slane %v768_v32, 3  ;;  %v776_v55 = vperm.slane %v768_v32, 4  ;;  %v777_v59 = vperm.slane %v768_v32, 5  ;;  %v779_v20 = vperm.slane %v768_v32, 7 }
 0x2e6   : > { %v810_v38 = vmul.f32 %v1898_v34, %v778_v33  ;;  %v804_v22 = vmul.f32 %v1872_v56, %v772_v35  ;;  %v805_v41 = vmul.f32 %v1870_v29, %v773_v28  ;;  %v806_v37 = vmul.f32 %v1875_v21, %v774_v44 }
 0x2e7   : > { %v807_v19 = vmul.f32 %v1890_v3, %v775_v58  ;;  %v808_v57 = vmul.f32 %v1884_v0, %v776_v55  ;;  %v809_v3 = vmul.f32 %v1904_v26, %v777_v59  ;;  %v811_v1 = vmul.f32 %v1887_v30, %v779_v20 }
 0x2e8   : > { %855 = vperm.xlu2 %1341, %v810_v38   ;;  %837 = vperm.xlu1 %1340, %v804_v22  }
 0x2ed   : > { %v761_v40 = vpop.xlane.xlu2 %760 }
 0x2ee   : > { %1378 = vrcp.f32 %v761_v40 }
 0x2f0   : > { %840 = vperm.xlu1 %1340, %v805_v41  }
 0x2f4   : > { %v1379_v45 = vpop.eup %1378 }
 0x2f5   : > { %v765_v23 = vmul.f32 %v1379_v45, %v761_v40 }
 0x2f7   : > { %v767_v48 = vsub.f32 2.0, %v765_v23 }
 0x2f8   : > { %843 = vperm.xlu1 %1340, %v806_v37  }
 0x2f9   : > { %v769_v50 = vmul.f32 %v1379_v45, %v767_v48 }
 0x2fb   : > { %v781_v34 = vperm.slane %v769_v50, 1  ;;  %v780_v25 = vperm.slane %v769_v50, 0  ;;  %v784_v29 = vperm.slane %v769_v50, 4  ;;  %v787_v54 = vperm.slane %v769_v50, 7 }
 0x2fc   : > { %v782_v60 = vperm.slane %v769_v50, 2  ;;  %v785_v0 = vperm.slane %v769_v50, 5 }
 0x2fd   : > { %v813_v56 = vmul.f32 %v1911_v43, %v781_v34  ;;  %v812_v53 = vmul.f32 %v1917_v47, %v780_v25  ;;  %v816_v21 = vmul.f32 %v1923_v49, %v784_v29  ;;  %v819_v42 = vmul.f32 %v1929_v52, %v787_v54 }
 0x2fe   : > { %v786_v43 = vperm.slane %v769_v50, 6  ;;  %v814_v62 = vmul.f32 %v1901_v39, %v782_v60  ;;  %v783_v49 = vperm.slane %v769_v50, 3  ;;  %v817_v63 = vmul.f32 %v1914_v46, %v785_v0 }
 0x2ff   : > { %864 = vperm.xlu0 %1339, %v813_v56   ;;  %861 = vperm.xlu2 %1341, %v812_v53  }
 0x300   : > { %846 = vperm.xlu1 %1340, %v807_v19   ;;  %v818_v47 = vmul.f32 %v1932_v61, %v786_v43  ;;  %v815_v52 = vmul.f32 %v1926_v51, %v783_v49 }
 0x307   : > { %873 = vperm.xlu0 %1339, %v816_v21   ;;  %882 = vperm.xlu2 %1341, %v819_v42  }
 0x308   : > { %849 = vperm.xlu1 %1340, %v808_v57  }
 0x30f   : > { %879 = vperm.xlu0 %1339, %v818_v47  }
 0x310   : > { %852 = vperm.xlu1 %1340, %v809_v3  }
 0x318   : > { %867 = vperm.xlu1 %1340, %v814_v62  }
 0x320   : > { %870 = vperm.xlu1 %1340, %v815_v52  }
 0x328   : > { %876 = vperm.xlu1 %1340, %v817_v63  }
 0x330   : > { %858 = vperm.xlu1 %1340, %v811_v1  }
 0x342   : > { %v1987_v2 = vpop.permute.xlu2 %855 }
 0x343   : > { %v940_v33 = vmul.f32 %v1987_v2, %v1707_v14 }
 0x345   : > { %v992_v28 = vsel %vm300_vm0, %v940_v33, 0.0 }
 0x346   : > { %v993_v45 = vrot.slane %v992_v28, 4 }
 0x348   : > { %v2024_v34 = vadd.f32 %v993_v45, %v992_v28 }
 0x34a   : > { %v995_v21 = vrot.slane %v2024_v34, 2 }
 0x359   : > { %v1991_v24 = vpop.permute.xlu2 %861 }
 0x35a   : > { %v1983_v61 = vpop.permute.xlu1 %837  ;;  %v942_v46 = vmul.f32 %v1991_v24, %v1667_v5  ;;  %v892_v43 = vperm.slane %v1991_v24, %v1811_v31 }
 0x35b   : > { %v934_v30 = vmul.f32 %v1983_v61, %v1664_v4  ;;  %v884_v59 = vperm.slane %v1983_v61, %v1811_v31 }
 0x35c   : > { %v1006_v27 = vsel %vm300_vm0, %v942_v46, 0.0 }
 0x35d   : > { %v1007_v38 = vrot.slane %v1006_v27, 4  ;;  %v950_v5 = vsel %vm300_vm0, %v934_v30, 0.0 }
 0x35e   : > { %v951_v40 = vrot.slane %v950_v5, 4 }
 0x35f   : > { %v1008_v41 = vadd.f32 %v1007_v38, %v1006_v27 }
 0x360   : > { %v952_v48 = vadd.f32 %v951_v40, %v950_v5 }
 0x361   : > { %v1999_v11 = vpop.permute.xlu2 %882  ;;  %v1009_v50 = vrot.slane %v1008_v41, 2 }
 0x362   : > { %v1985_v26 = vpop.permute.xlu1 %840  ;;  %v949_v35 = vmul.f32 %v1999_v11, %v1727_v18  ;;  %v953_v53 = vrot.slane %v952_v48, 2  ;;  %v899_v46 = vperm.slane %v1999_v11, %v1811_v31 }
 0x363   : > { %v935_v22 = vmul.f32 %v1985_v26, %v1687_v9  ;;  %v1010_v19 = vadd.f32 %v1009_v50, %v1008_v41  ;;  %v885_v47 = vperm.slane %v1985_v26, %v1811_v31 }
 0x364   : > { %v1055_v4 = vsel %vm300_vm0, %v949_v35, 0.0  ;;  %v2042_v60 = vadd.f32 %v953_v53, %v952_v48 }
 0x365   : > { %v1056_v23 = vrot.slane %v1055_v4, 4  ;;  %v957_v14 = vsel %vm300_vm0, %v935_v22, 0.0  ;;  %v1011_v0 = vrot.slane %v1010_v19, 1 }
 0x366   : > { %v958_v9 = vrot.slane %v957_v14, 4  ;;  %v955_v5 = vrot.slane %v2042_v60, 1 }
 0x367   : > { %v1057_v25 = vadd.f32 %v1056_v23, %v1055_v4 }
 0x368   : > { %v959_v29 = vadd.f32 %v958_v9, %v957_v14 }
 0x369   : > { %v1058_v42 = vrot.slane %v1057_v25, 2 }
 0x36a   : > { %v1989_v39 = vpop.permute.xlu1 %843  ;;  %v960_v63 = vrot.slane %v959_v29, 2 }
 0x36b   : > { %v936_v58 = vmul.f32 %v1989_v39, %v1704_v13  ;;  %v2050_v61 = vadd.f32 %v1058_v42, %v1057_v25 }
 0x36c   : > { %v2066_v22 = vadd.f32 %v960_v63, %v959_v29 }
 0x36d   : > { %v964_v54 = vsel %vm300_vm0, %v936_v58, 0.0  ;;  %v1060_v4 = vrot.slane %v2050_v61, 1 }
 0x36e   : > { %v965_v62 = vrot.slane %v964_v54, 4 }
 0x370   : > { %v966_v27 = vadd.f32 %v965_v62, %v964_v54 }
 0x371   : > { %v1997_v36 = vpop.permute.xlu0 %864 }
 0x372   : > { %v1993_v51 = vpop.permute.xlu1 %846  ;;  %v943_v18 = vmul.f32 %v1997_v36, %v1684_v8  ;;  %v890_v8 = vperm.slane %v1987_v2, %v1811_v31  ;;  %v967_v50 = vrot.slane %v966_v27, 2 }
 0x373   : > { %v937_v55 = vmul.f32 %v1993_v51, %v1724_v17  ;;  %v887_v42 = vperm.slane %v1993_v51, %v1811_v31 }
 0x374   : > { %v1013_v56 = vsel %vm300_vm0, %v943_v18, 0.0 }
 0x375   : > { %v1014_v13 = vrot.slane %v1013_v56, 4  ;;  %v971_v20 = vsel %vm300_vm0, %v937_v55, 0.0 }
 0x376   : > { %v972_v33 = vrot.slane %v971_v20, 4 }
 0x377   : > { %v1015_v26 = vadd.f32 %v1014_v13, %v1013_v56 }
 0x378   : > { %v973_v9 = vadd.f32 %v972_v33, %v971_v20 }
 0x379   : > { %v2015_v44 = vpop.permute.xlu0 %873  ;;  %v1016_v40 = vrot.slane %v1015_v26, 2 }
 0x37a   : > { %v2004_v32 = vpop.permute.xlu1 %849  ;;  %v946_v49 = vmul.f32 %v2015_v44, %v1670_v6  ;;  %v900_v6 = vsel %vm548_vm1, %v885_v47, %v884_v59  ;;  %v2088_v59 = vadd.f32 %v967_v50, %v966_v27  ;;  %v974_v47 = vrot.slane %v973_v9, 2 }
 0x37b   : > { %v938_v52 = vmul.f32 %v2004_v32, %v1673_v7  ;;  %v886_v7 = vperm.slane %v1989_v39, %v1811_v31  ;;  %v893_v39 = vperm.slane %v1997_v36, %v1811_v31  ;;  %v1017_v29 = vadd.f32 %v1016_v40, %v1015_v26 }
 0x37c   : > { %v1034_v35 = vsel %vm300_vm0, %v946_v49, 0.0  ;;  %v896_v49 = vperm.slane %v2015_v44, %v1811_v31  ;;  %v888_v51 = vperm.slane %v2004_v32, %v1811_v31 }
 0x37d   : > { %v978_v38 = vsel %vm300_vm0, %v938_v52, 0.0  ;;  %v1035_v45 = vrot.slane %v1034_v35, 4  ;;  %v901_v48 = vsel %vm550_vm2, %v886_v7, %v900_v6  ;;  %v1018_v63 = vrot.slane %v1017_v29, 1  ;;  %v1380_v7 = vld [vmem:[%s1653_s15 + $0x68] sm:$0xff] }
 0x37e   : > { %v979_v23 = vrot.slane %v978_v38, 4 }
 0x37f   : > { %v1036_v13 = vadd.f32 %v1035_v45, %v1034_v35  ;;  %v975_v45 = vadd.f32 %v974_v47, %v973_v9 }
 0x381   : > { %v2039_v3 = vpop.permute.xlu0 %879 }
 0x382   : > { %v2018_v37 = vpop.permute.xlu1 %852  ;;  %v898_v44 = vperm.slane %v2039_v3, %v1811_v31 }
 0x383   : > { %v939_v30 = vmul.f32 %v2018_v37, %v1690_v10  ;;  %v889_v27 = vperm.slane %v2018_v37, %v1811_v31 }
 0x385   : > { %v985_v14 = vsel %vm300_vm0, %v939_v30, 0.0 }
 0x386   : > { %v986_v54 = vrot.slane %v985_v14, 4 }
 0x388   : > { %v987_v20 = vadd.f32 %v986_v54, %v985_v14 }
 0x38a   : > { %v868_v57 = vpop.permute.xlu1 %867  ;;  %v988_v40 = vrot.slane %v987_v20, 2 }
 0x38b   : > { %v944_v17 = vmul.f32 %v868_v57, %v1701_v12  ;;  %v948_v12 = vmul.f32 %v2039_v3, %v1710_v15  ;;  %v2063_v15 = vadd.f32 %v1011_v0, %v1010_v19  ;;  %v894_v58 = vperm.slane %v868_v57, %v1811_v31 }
 0x38c   : > { %v962_v19 = vrot.slane %v2066_v22, 1  ;;  %v980_v57 = vadd.f32 %v979_v23, %v978_v38  ;;  %v989_v54 = vadd.f32 %v988_v40, %v987_v20  ;;  %v956_v20 = vadd.f32 %v955_v5, %v2042_v60 }
 0x38d   : > { %v1020_v1 = vsel %vm300_vm0, %v944_v17, 0.0  ;;  %v1048_v10 = vsel %vm300_vm0, %v948_v12, 0.0  ;;  %v1037_v12 = vrot.slane %v1036_v13, 2 }
 0x38e   : > { %v1021_v24 = vrot.slane %v1020_v1, 4  ;;  %v1049_v36 = vrot.slane %v1048_v10, 4 }
 0x38f   : > { %v1038_v23 = vadd.f32 %v1037_v12, %v1036_v13  ;;  %v1381_v13 = vld [vmem:[%s1653_s15 + $0x38] sm:$0xff]  ;;  %s1114_s15 = sshll.u32 %s262_s8, 4  ;;  %s1115_s15 = int_to_ptr.vmem [resolvable:$true] %s1114_s15 }
 0x390   : > { %v1022_v28 = vadd.f32 %v1021_v24, %v1020_v1  ;;  %v1050_v52 = vadd.f32 %v1049_v36, %v1048_v10  ;;  %v981_v24 = vrot.slane %v980_v57, 2 }
 0x392   : > { %v871_v41 = vpop.permute.xlu1 %870  ;;  %v1023_v25 = vrot.slane %v1022_v28, 2  ;;  %v1051_v32 = vrot.slane %v1050_v52, 2 }
 0x393   : > { %v945_v18 = vmul.f32 %v871_v41, %v1721_v16  ;;  %v895_v56 = vperm.slane %v871_v41, %v1811_v31  ;;  %v907_v16 = vsel %vm548_vm1, %v893_v39, %v892_v43  ;;  %v902_v41 = vsel %vm552_vm3, %v887_v42, %v901_v48 }
 0x394   : > { %v908_v17 = vsel %vm550_vm2, %v894_v58, %v907_v16  ;;  %v1024_v0 = vadd.f32 %v1023_v25, %v1022_v28  ;;  %v903_v50 = vsel %vm554_vm4, %v888_v51, %v902_v41  ;;  %v982_v58 = vadd.f32 %v981_v24, %v980_v57 }
 0x395   : > { %v1027_v53 = vsel %vm300_vm0, %v945_v18, 0.0  ;;  %v909_v43 = vsel %vm552_vm3, %v895_v56, %v908_v17  ;;  %v1019_v18 = vadd.f32 %v1018_v63, %v1017_v29  ;;  %v963_v25 = vadd.f32 %v962_v19, %v2066_v22 }
 0x396   : > { %v1028_v55 = vrot.slane %v1027_v53, 4  ;;  %v910_v35 = vsel %vm554_vm4, %v896_v49, %v909_v43  ;;  %v1025_v38 = vrot.slane %v1024_v0, 1  ;;  %v1052_v56 = vadd.f32 %v1051_v32, %v1050_v52 }
 0x397   : > { %v904_v48 = vsel %vm556_vm5, %v889_v27, %v903_v50  ;;  %v976_v29 = vrot.slane %v975_v45, 1  ;;  %v1039_v16 = vrot.slane %v1038_v23, 1  ;;  %v1085_v22 = vsel %vm548_vm1, %v1019_v18, %v2063_v15 }
 0x398   : > { %v1029_v62 = vadd.f32 %v1028_v55, %v1027_v53  ;;  %v1026_v9 = vadd.f32 %v1025_v38, %v1024_v0  ;;  %v969_v53 = vrot.slane %v2088_v59, 1  ;;  %v983_v19 = vrot.slane %v982_v58, 1 }
 0x399   : > { %v905_v17 = vsel %vm558_vm6, %v890_v8, %v904_v48  ;;  %v990_v43 = vrot.slane %v989_v54, 1  ;;  %v1040_v8 = vadd.f32 %v1039_v16, %v1038_v23  ;;  %v1061_v24 = vadd.f32 %v1060_v4, %v2050_v61 }
 0x39a   : > { %v1030_v1 = vrot.slane %v1029_v62, 2  ;;  %v877_v26 = vpop.permute.xlu1 %876  ;;  %v1086_v49 = vsel %vm550_vm2, %v1026_v9, %v1085_v22  ;;  %v970_v2 = vadd.f32 %v969_v53, %v2088_v59 }
 0x39b   : > { %v897_v6 = vperm.slane %v877_v26, %v1811_v31  ;;  %v947_v30 = vmul.f32 %v1380_v7, %v877_v26  ;;  %v991_v59 = vadd.f32 %v990_v43, %v989_v54 }
 0x39c   : > { %v1031_v33 = vadd.f32 %v1030_v1, %v1029_v62  ;;  %v1053_v62 = vrot.slane %v1052_v56, 1  ;;  %v977_v1 = vadd.f32 %v976_v29, %v975_v45 }
 0x39d   : > { %v911_v28 = vsel %vm556_vm5, %v897_v6, %v910_v35  ;;  %v1041_v39 = vsel %vm300_vm0, %v947_v30, 0.0  ;;  %v984_v6 = vadd.f32 %v983_v19, %v982_v58 }
 0x39e   : > { %v1032_v3 = vrot.slane %v1031_v33, 1  ;;  %v912_v10 = vsel %vm558_vm6, %v898_v44, %v911_v28  ;;  %v1042_v37 = vrot.slane %v1041_v39, 4  ;;  %v1054_v7 = vadd.f32 %v1053_v62, %v1052_v56 }
 0x39f   : > { %v913_v14 = vsel %vm560_vm7, %v899_v46, %v912_v10 }
 0x3a0   : > { %v1043_v36 = vadd.f32 %v1042_v37, %v1041_v39  ;;  %917 = vst.msk [vmem:[%s2109_s16 + $0x8] sm:$0xff] %vm571_vm8, %v913_v14  ;;  %v1033_v11 = vadd.f32 %v1032_v3, %v1031_v33 }
 0x3a2   : > { %v1044_v55 = vrot.slane %v1043_v36, 2  ;;  %v859_v46 = vpop.permute.xlu1 %858  ;;  %v1087_v63 = vsel %vm552_vm3, %v1033_v11, %v1086_v49 }
 0x3a3   : > { %v891_v42 = vperm.slane %v859_v46, %v1811_v31  ;;  %v941_v57 = vmul.f32 %v1381_v13, %v859_v46  ;;  %v996_v31 = vadd.f32 %v995_v21, %v2024_v34  ;;  %v1088_v34 = vsel %vm554_vm4, %v1040_v8, %v1087_v63 }
 0x3a4   : > { %v1045_v47 = vadd.f32 %v1044_v55, %v1043_v36  ;;  %v1078_v21 = vsel %vm548_vm1, %v963_v25, %v956_v20 }
 0x3a5   : > { %v906_v52 = vsel %vm560_vm7, %v891_v42, %v905_v17  ;;  %v999_v0 = vsel %vm300_vm0, %v941_v57, 0.0  ;;  %v997_v27 = vrot.slane %v996_v31, 1  ;;  %v1079_v60 = vsel %vm550_vm2, %v970_v2, %v1078_v21 }
 0x3a6   : > { %v1046_v15 = vrot.slane %v1045_v47, 1  ;;  %916 = vst.msk [vmem:[%s2109_s16] sm:$0xff] %vm571_vm8, %v906_v52  ;;  %v1000_v51 = vrot.slane %v999_v0, 4  ;;  %v1080_v61 = vsel %vm552_vm3, %v977_v1, %v1079_v60 }
 0x3a7   : > { %v1081_v35 = vsel %vm554_vm4, %v984_v6, %v1080_v61  ;;  %v998_v28 = vadd.f32 %v997_v27, %v996_v31 }
 0x3a8   : > { %v1047_v26 = vadd.f32 %v1046_v15, %v1045_v47  ;;  %v1001_v12 = vadd.f32 %v1000_v51, %v999_v0  ;;  %v1082_v32 = vsel %vm556_vm5, %v991_v59, %v1081_v35 }
 0x3a9   : > { %v1083_v40 = vsel %vm558_vm6, %v998_v28, %v1082_v32 }
 0x3aa   : > { %v1089_v30 = vsel %vm556_vm5, %v1047_v26, %v1088_v34  ;;  %v1002_v44 = vrot.slane %v1001_v12, 2 }
 0x3ab   : > { %v1090_v5 = vsel %vm558_vm6, %v1054_v7, %v1089_v30 }
 0x3ac   : > { %v1091_v4 = vsel %vm560_vm7, %v1061_v24, %v1090_v5  ;;  %v1003_v33 = vadd.f32 %v1002_v44, %v1001_v12 }
 0x3ad   : > { %1095 = vst.msk [vmem:[%s262_s8 + $0x8] sm:$0xff] %vm300_vm0, %v1091_v4 }
 0x3ae   : > { %v1004_v38 = vrot.slane %v1003_v33, 1 }
 0x3b0   : > { %v1005_v39 = vadd.f32 %v1004_v38, %v1003_v33 }
 0x3b2   : > { %v1084_v3 = vsel %vm560_vm7, %v1005_v39, %v1083_v40 }
 0x3b3   : > { %1094 = vst.msk [vmem:[%s262_s8] sm:$0xff] %vm300_vm0, %v1084_v3 }
 0x3b4   : > { %1469 = shalt.err (!%p1466_p12)
}
 0x3b5   : > { %s1518_s28 = smov 128   ;;  %s1519_s23 = smov 8  }
 0x3b6   : > { %1283 = dma.vmem_to_hbm [thread:$0]  (%p1619_p3), %s1115_s15, 256, %s1117_s24, %s1097_s29, %s1518_s28, %s1518_s28, %s1519_s23  }
 0x3b7 PF: > { %s1134_s26 = sand.u32 1, %s1500_s18   ;;  %p2207_p13 = scmp.ge.s32.totalorder %s1512_s21, 2 }
 0x3b8   : > { %s1135_s22 = scalar_lea.sflag [#allocation4], %s1134_s26 }
 0x3b9   : > { %p1294_p0 = pnand %p2207_p13, %p1585_p6 }
 0x3bb   : > { %p1295_p5 = pneg %p1294_p0 }
 0x3bd   : > { %1495 = dma.done.wait (%p1295_p5), %s1135_s22, 256  }
 0x3be   : > { %1497 = vsyncadd (%p1295_p5), %s1135_s22, 4294967040  ;;  %p20_p7 = scmp.ge.s32.totalorder %s1603_s7, 4   ;;  %s2208_s18 = smov %s1504_s19 }
 0x3bf   : > { %s2209_s19 = smov %s1508_s20  ;;  %s2210_s20 = smov %s1615_s12 }
 0x3c0   : > { %s2211_s21 = smov %s1603_s7  ;;  %22 = sbr.rel (!%p20_p7) target bundleno = 6 (0x6), region = 97 }
 0x3c5   :  { %1149 = vsyncpa [#allocation3], 1 }
 0x3c6   :  { %1151 = vsyncpa [#allocation3 + $0x1], 1 }
 0x3c7   :  { %1152 = vsyncpa [#allocation6], 1 }
 0x3c8   :  { %1153 = vsyncpa [#allocation4], 1 }
 0x3c9   :  { %1155 = vsyncpa [#allocation4 + $0x1], 1 }

</bundles_post_ra>
